<compile_context>
chip_gen: v5e
topology: v5e:2x2
jax: 0.10.0
libtpu: 0.0.40
codegen_flags: <defaults>
</compile_context>

<pallas_src>
import jax
import jax.numpy as jnp
from jax.experimental import pallas as pl
from jax.experimental.pallas import tpu as pltpu

LANE = 128


def _round_up(n, m):
    return ((n + m - 1) // m) * m


def _mlp_kernel(x_ref,
                w1_ref, b1_ref,
                w2_ref, b2_ref,
                w3_ref, b3_ref,
                w4_ref, b4_ref,
                o_ref):
    # x arrives unpadded f32; cast to bf16 in-VMEM (MXU zero-pads K itself).
    x = x_ref[...].astype(jnp.bfloat16)
    # fc1 (BN1 scale pre-folded into w1) + shift + ReLU; dropout == identity.
    h = jnp.dot(x, w1_ref[...], preferred_element_type=jnp.float32)
    h = jnp.maximum(h + b1_ref[...], 0.0).astype(jnp.bfloat16)
    # fc2 + shift + ReLU
    h = jnp.dot(h, w2_ref[...], preferred_element_type=jnp.float32)
    h = jnp.maximum(h + b2_ref[...], 0.0).astype(jnp.bfloat16)
    # fc3 + shift + ReLU
    h = jnp.dot(h, w3_ref[...], preferred_element_type=jnp.float32)
    h = jnp.maximum(h + b3_ref[...], 0.0).astype(jnp.bfloat16)
    # fc4 (plain linear; output lane-padded to a multiple of 128)
    o_ref[...] = (jnp.dot(h, w4_ref[...], preferred_element_type=jnp.float32)
                  + b4_ref[...])


def _resident_spec(shape):
    # Full-array block with constant index_map: DMA'd once, stays VMEM-resident
    # across all batch tiles.
    return pl.BlockSpec(shape, lambda i: (0,) * len(shape))


def label_inference_head_forward(x, kernel_params, out_features, *, tb=None):
    """x: [B, in_features] float32 -> [B, out_features] float32 (eval mode)."""
    (w1, b1, w2, b2, w3, b3, w4, b4) = kernel_params
    B, in_features = x.shape
    assert w1.shape[0] == in_features
    out_pad = w4.shape[1]          # padded output lanes (multiple of 128)

    if tb is None:
        # Large tiles amortize per-grid-step overhead; aim for >=2 tiles so
        # both v7x TensorCores get work; cap at 1024 rows so the working set
        # stays well under every generation's default scoped-VMEM limit.
        tb = min(1024, max(16, _round_up(-(-B // 2), 16)))
    tb = max(16, _round_up(tb, 16))
    b_pad = _round_up(B, tb)

    # Pad only the batch dim (if needed). K stays unpadded; the bf16 cast
    # happens inside the kernel -> no extra HBM pre-pass over x.
    xp = x if b_pad == B else jnp.pad(x, ((0, b_pad - B), (0, 0)))

    flops = 2 * b_pad * (in_features * 512 + 512 * 256 + 256 * 128
                         + 128 * out_pad)
    weight_bytes = sum(int(a.size) * a.dtype.itemsize
                       for a in (w1, b1, w2, b2, w3, b3, w4, b4))
    bytes_accessed = (b_pad * in_features * 4       # x read (f32)
                      + b_pad * out_pad * 4         # out write (f32)
                      + weight_bytes)               # resident params, once

    out = pl.pallas_call(
        _mlp_kernel,
        out_shape=jax.ShapeDtypeStruct((b_pad, out_pad), jnp.float32),
        grid_spec=pltpu.PrefetchScalarGridSpec(
            num_scalar_prefetch=0,
            grid=(b_pad // tb,),
            in_specs=[
                pl.BlockSpec((tb, in_features), lambda i: (i, 0)),
                _resident_spec(w1.shape), _resident_spec(b1.shape),
                _resident_spec(w2.shape), _resident_spec(b2.shape),
                _resident_spec(w3.shape), _resident_spec(b3.shape),
                _resident_spec(w4.shape), _resident_spec(b4.shape),
            ],
            out_specs=pl.BlockSpec((tb, out_pad), lambda i: (i, 0)),
        ),
        compiler_params=pltpu.CompilerParams(
            dimension_semantics=("parallel",)),
        cost_estimate=pl.CostEstimate(
            flops=flops, transcendentals=0, bytes_accessed=bytes_accessed),
    )(xp, w1, b1, w2, b2, w3, b3, w4, b4)

    return out[:B, :out_features]


def make_params(key, in_features, out_features=10, eps=1e-5):
    """Deterministic synthetic params with eval-mode BN folded into (W, shift).

    Returns per-layer (w_folded [in, out] f32, shift [out] f32).
    """
    dims = [(in_features, 512), (512, 256), (256, 128), (128, out_features)]
    keys = jax.random.split(key, 6 * len(dims))
    folded = []
    ki = 0
    for layer, (fin, fout) in enumerate(dims):
        bound = 1.0 / jnp.sqrt(jnp.float32(fin))
        w = jax.random.uniform(keys[ki], (fin, fout), jnp.float32,
                               -bound, bound); ki += 1
        b = jax.random.uniform(keys[ki], (fout,), jnp.float32,
                               -bound, bound); ki += 1
        if layer < 3:  # fc1/fc2/fc3 are followed by BatchNorm1d
            gamma = jax.random.uniform(keys[ki], (fout,), jnp.float32,
                                       0.5, 1.5); ki += 1
            beta = 0.1 * jax.random.normal(keys[ki], (fout,),
                                           jnp.float32); ki += 1
            rmean = 0.1 * jax.random.normal(keys[ki], (fout,),
                                            jnp.float32); ki += 1
            rvar = jax.random.uniform(keys[ki], (fout,), jnp.float32,
                                      0.5, 1.5); ki += 1
            scale = gamma / jnp.sqrt(rvar + eps)
            folded.append((w * scale[None, :], (b - rmean) * scale + beta))
        else:  # fc4: plain linear
            ki += 4
            folded.append((w, b))
    return folded


def prepare_kernel_params(folded, in_features, out_features):
    """Pad fc4 N to a lane multiple; cast weights to bf16, biases stay f32."""
    (w1, s1), (w2, s2), (w3, s3), (w4, b4) = folded
    out_pad = _round_up(out_features, LANE)
    w4p = jnp.zeros((w4.shape[0], out_pad),
                    jnp.float32).at[:, :out_features].set(w4)
    b4p = jnp.zeros((out_pad,), jnp.float32).at[:out_features].set(b4)
    return (w1.astype(jnp.bfloat16), s1.reshape(1, -1),
            w2.astype(jnp.bfloat16), s2.reshape(1, -1),
            w3.astype(jnp.bfloat16), s3.reshape(1, -1),
            w4p.astype(jnp.bfloat16), b4p.reshape(1, -1))


def reference_forward(x, kernel_params, out_features):
    """Pure-JAX reference replicating the kernel's bf16/f32-accumulate path."""
    (w1, b1, w2, b2, w3, b3, w4, b4) = kernel_params
    h = x.astype(jnp.bfloat16)
    h = jnp.maximum(jnp.dot(h, w1, preferred_element_type=jnp.float32) + b1,
                    0.0).astype(jnp.bfloat16)
    h = jnp.maximum(jnp.dot(h, w2, preferred_element_type=jnp.float32) + b2,
                    0.0).astype(jnp.bfloat16)
    h = jnp.maximum(jnp.dot(h, w3, preferred_element_type=jnp.float32) + b3,
                    0.0).astype(jnp.bfloat16)
    o = jnp.dot(h, w4, preferred_element_type=jnp.float32) + b4
    return o[:, :out_features]


def reference_forward_f32(x, folded, out_features):
    """Unfused full-f32 reference (checks bf16 drift vs the original module)."""
    (w1, s1), (w2, s2), (w3, s3), (w4, b4) = folded
    h = jnp.maximum(x @ w1 + s1[None, :], 0.0)
    h = jnp.maximum(h @ w2 + s2[None, :], 0.0)
    h = jnp.maximum(h @ w3 + s3[None, :], 0.0)
    return (h @ w4 + b4[None, :])[:, :out_features]


if __name__ == "__main__":
    key = jax.random.PRNGKey(0)
    k_x, k_x2, k_p = jax.random.split(key, 3)

    in_features, out_features = 32, 10
    folded = make_params(k_p, in_features, out_features)
    kparams = prepare_kernel_params(folded, in_features, out_features)

    # Small batch (matches the module's typical usage).
    x_small = jax.random.normal(k_x, (8, in_features), jnp.float32)
    out_small = jax.block_until_ready(
        label_inference_head_forward(x_small, kparams, out_features))
    assert out_small.shape == (8, out_features)
    ref_small = reference_forward(x_small, kparams, out_features)
    assert jnp.allclose(out_small, ref_small, atol=2e-2, rtol=2e-2), \
        "mismatch vs bf16-path reference (small batch)"
    ref_small_f32 = reference_forward_f32(x_small, folded, out_features)
    assert jnp.allclose(out_small, ref_small_f32, atol=5e-2, rtol=5e-2), \
        "mismatch vs unfused f32 reference (small batch)"

    # Larger, non-multiple batch exercises batch padding + a 2-tile grid.
    x_large = jax.random.normal(k_x2, (1000, in_features), jnp.float32)
    out_large = jax.block_until_ready(
        label_inference_head_forward(x_large, kparams, out_features))
    assert out_large.shape == (1000, out_features)
    ref_large = reference_forward(x_large, kparams, out_features)
    assert jnp.allclose(out_large, ref_large, atol=2e-2, rtol=2e-2), \
        "mismatch vs bf16-path reference (large batch)"
    ref_large_f32 = reference_forward_f32(x_large, folded, out_features)
    assert jnp.allclose(out_large, ref_large_f32, atol=5e-2, rtol=5e-2), \
        "mismatch vs unfused f32 reference (large batch)"

    print("KERNEL_OK")
</pallas_src>

<mosaic_0001>
module attributes {stable_mosaic.version = 11 : i64} {
  func.func @_mlp_kernel(%arg0: i32, %arg1: memref<16x32xf32, #tpu.memory_space<vmem>>, %arg2: memref<32x512xbf16, #tpu.memory_space<vmem>>, %arg3: memref<1x512xf32, #tpu.memory_space<vmem>>, %arg4: memref<512x256xbf16, #tpu.memory_space<vmem>>, %arg5: memref<1x256xf32, #tpu.memory_space<vmem>>, %arg6: memref<256x128xbf16, #tpu.memory_space<vmem>>, %arg7: memref<1x128xf32, #tpu.memory_space<vmem>>, %arg8: memref<128x128xbf16, #tpu.memory_space<vmem>>, %arg9: memref<1x128xf32, #tpu.memory_space<vmem>>, %arg10: memref<16x128xf32, #tpu.memory_space<vmem>>) attributes {dimension_semantics = [#tpu.dimension_semantics<parallel>], iteration_bounds = array<i64: 1>, scalar_prefetch = 0 : i64, scratch_operands = 0 : i64, tpu.core_type = #tpu.core_type<tc>, window_params = [{transform_indices = @transform_0, window_bounds = array<i64: 16, 32>}, {pipeline_mode = #tpu.pipeline_mode<synchronous>, transform_indices = @transform_1, window_bounds = array<i64: 32, 512>}, {pipeline_mode = #tpu.pipeline_mode<synchronous>, transform_indices = @transform_2, window_bounds = array<i64: 1, 512>}, {pipeline_mode = #tpu.pipeline_mode<synchronous>, transform_indices = @transform_3, window_bounds = array<i64: 512, 256>}, {pipeline_mode = #tpu.pipeline_mode<synchronous>, transform_indices = @transform_4, window_bounds = array<i64: 1, 256>}, {pipeline_mode = #tpu.pipeline_mode<synchronous>, transform_indices = @transform_5, window_bounds = array<i64: 256, 128>}, {pipeline_mode = #tpu.pipeline_mode<synchronous>, transform_indices = @transform_6, window_bounds = array<i64: 1, 128>}, {pipeline_mode = #tpu.pipeline_mode<synchronous>, transform_indices = @transform_7, window_bounds = array<i64: 128, 128>}, {pipeline_mode = #tpu.pipeline_mode<synchronous>, transform_indices = @transform_8, window_bounds = array<i64: 1, 128>}, {transform_indices = @transform_9, window_bounds = array<i64: 16, 128>}]} {
    %c0 = arith.constant 0 : index
    %c0_0 = arith.constant 0 : index
    %0 = vector.load %arg1[%c0, %c0_0] : memref<16x32xf32, #tpu.memory_space<vmem>>, vector<16x32xf32>
    %1 = arith.truncf %0 : vector<16x32xf32> to vector<16x32xbf16>
    %c0_1 = arith.constant 0 : index
    %c0_2 = arith.constant 0 : index
    %2 = vector.load %arg2[%c0_1, %c0_2] : memref<32x512xbf16, #tpu.memory_space<vmem>>, vector<32x512xbf16>
    %cst = arith.constant dense<0.000000e+00> : vector<16x512xf32>
    %3 = tpu.matmul %1, %2, %cst {dimension_numbers = #tpu.dot_dimension_numbers<[1], [0], [0], [1], [0, 0, 1, 1], [], []>} : vector<16x32xbf16>, vector<32x512xbf16>, vector<16x512xf32> -> vector<16x512xf32>
    %c0_3 = arith.constant 0 : index
    %c0_4 = arith.constant 0 : index
    %4 = vector.load %arg3[%c0_3, %c0_4] : memref<1x512xf32, #tpu.memory_space<vmem>>, vector<1x512xf32>
    %5 = vector.broadcast %4 : vector<1x512xf32> to vector<16x512xf32>
    %6 = arith.addf %3, %5 : vector<16x512xf32>
    %cst_5 = arith.constant 0.000000e+00 : f32
    %7 = vector.broadcast %cst_5 : f32 to vector<16x512xf32>
    %8 = arith.maximumf %6, %7 : vector<16x512xf32>
    %9 = arith.truncf %8 : vector<16x512xf32> to vector<16x512xbf16>
    %c0_6 = arith.constant 0 : index
    %c0_7 = arith.constant 0 : index
    %10 = vector.load %arg4[%c0_6, %c0_7] : memref<512x256xbf16, #tpu.memory_space<vmem>>, vector<512x256xbf16>
    %cst_8 = arith.constant dense<0.000000e+00> : vector<16x256xf32>
    %11 = tpu.matmul %9, %10, %cst_8 {dimension_numbers = #tpu.dot_dimension_numbers<[1], [0], [0], [1], [0, 0, 1, 1], [], []>} : vector<16x512xbf16>, vector<512x256xbf16>, vector<16x256xf32> -> vector<16x256xf32>
    %c0_9 = arith.constant 0 : index
    %c0_10 = arith.constant 0 : index
    %12 = vector.load %arg5[%c0_9, %c0_10] : memref<1x256xf32, #tpu.memory_space<vmem>>, vector<1x256xf32>
    %13 = vector.broadcast %12 : vector<1x256xf32> to vector<16x256xf32>
    %14 = arith.addf %11, %13 : vector<16x256xf32>
    %cst_11 = arith.constant 0.000000e+00 : f32
    %15 = vector.broadcast %cst_11 : f32 to vector<16x256xf32>
    %16 = arith.maximumf %14, %15 : vector<16x256xf32>
    %17 = arith.truncf %16 : vector<16x256xf32> to vector<16x256xbf16>
    %c0_12 = arith.constant 0 : index
    %c0_13 = arith.constant 0 : index
    %18 = vector.load %arg6[%c0_12, %c0_13] : memref<256x128xbf16, #tpu.memory_space<vmem>>, vector<256x128xbf16>
    %cst_14 = arith.constant dense<0.000000e+00> : vector<16x128xf32>
    %19 = tpu.matmul %17, %18, %cst_14 {dimension_numbers = #tpu.dot_dimension_numbers<[1], [0], [0], [1], [0, 0, 1, 1], [], []>} : vector<16x256xbf16>, vector<256x128xbf16>, vector<16x128xf32> -> vector<16x128xf32>
    %c0_15 = arith.constant 0 : index
    %c0_16 = arith.constant 0 : index
    %20 = vector.load %arg7[%c0_15, %c0_16] : memref<1x128xf32, #tpu.memory_space<vmem>>, vector<1x128xf32>
    %21 = vector.broadcast %20 : vector<1x128xf32> to vector<16x128xf32>
    %22 = arith.addf %19, %21 : vector<16x128xf32>
    %cst_17 = arith.constant 0.000000e+00 : f32
    %23 = vector.broadcast %cst_17 : f32 to vector<16x128xf32>
    %24 = arith.maximumf %22, %23 : vector<16x128xf32>
    %25 = arith.truncf %24 : vector<16x128xf32> to vector<16x128xbf16>
    %c0_18 = arith.constant 0 : index
    %c0_19 = arith.constant 0 : index
    %26 = vector.load %arg8[%c0_18, %c0_19] : memref<128x128xbf16, #tpu.memory_space<vmem>>, vector<128x128xbf16>
    %cst_20 = arith.constant dense<0.000000e+00> : vector<16x128xf32>
    %27 = tpu.matmul %25, %26, %cst_20 {dimension_numbers = #tpu.dot_dimension_numbers<[1], [0], [0], [1], [0, 0, 1, 1], [], []>} : vector<16x128xbf16>, vector<128x128xbf16>, vector<16x128xf32> -> vector<16x128xf32>
    %c0_21 = arith.constant 0 : index
    %c0_22 = arith.constant 0 : index
    %28 = vector.load %arg9[%c0_21, %c0_22] : memref<1x128xf32, #tpu.memory_space<vmem>>, vector<1x128xf32>
    %29 = vector.broadcast %28 : vector<1x128xf32> to vector<16x128xf32>
    %30 = arith.addf %27, %29 : vector<16x128xf32>
    %c0_23 = arith.constant 0 : index
    %c0_24 = arith.constant 0 : index
    %31 = vector.load %arg10[%c0_23, %c0_24] : memref<16x128xf32, #tpu.memory_space<vmem>>, vector<16x128xf32>
    tpu.vector_store %arg10[%c0_23, %c0_24], %30 {strides = array<i32>} : memref<16x128xf32, #tpu.memory_space<vmem>>, vector<16x128xf32>,
    return
  }
  func.func @transform_0(%arg0: i32) -> (i32, i32) {
    %c0_i32 = arith.constant 0 : i32
    %c0_i32_0 = arith.constant 0 : i32
    return %arg0, %c0_i32 : i32, i32
  }
  func.func @transform_1(%arg0: i32) -> (i32, i32) {
    %c0_i32 = arith.constant 0 : i32
    %c0_i32_0 = arith.constant 0 : i32
    %c0_i32_1 = arith.constant 0 : i32
    return %c0_i32, %c0_i32_0 : i32, i32
  }
  func.func @transform_2(%arg0: i32) -> (i32, i32) {
    %c0_i32 = arith.constant 0 : i32
    %c0_i32_0 = arith.constant 0 : i32
    %c0_i32_1 = arith.constant 0 : i32
    return %c0_i32, %c0_i32_0 : i32, i32
  }
  func.func @transform_3(%arg0: i32) -> (i32, i32) {
    %c0_i32 = arith.constant 0 : i32
    %c0_i32_0 = arith.constant 0 : i32
    %c0_i32_1 = arith.constant 0 : i32
    return %c0_i32, %c0_i32_0 : i32, i32
  }
  func.func @transform_4(%arg0: i32) -> (i32, i32) {
    %c0_i32 = arith.constant 0 : i32
    %c0_i32_0 = arith.constant 0 : i32
    %c0_i32_1 = arith.constant 0 : i32
    return %c0_i32, %c0_i32_0 : i32, i32
  }
  func.func @transform_5(%arg0: i32) -> (i32, i32) {
    %c0_i32 = arith.constant 0 : i32
    %c0_i32_0 = arith.constant 0 : i32
    %c0_i32_1 = arith.constant 0 : i32
    return %c0_i32, %c0_i32_0 : i32, i32
  }
  func.func @transform_6(%arg0: i32) -> (i32, i32) {
    %c0_i32 = arith.constant 0 : i32
    %c0_i32_0 = arith.constant 0 : i32
    %c0_i32_1 = arith.constant 0 : i32
    return %c0_i32, %c0_i32_0 : i32, i32
  }
  func.func @transform_7(%arg0: i32) -> (i32, i32) {
    %c0_i32 = arith.constant 0 : i32
    %c0_i32_0 = arith.constant 0 : i32
    %c0_i32_1 = arith.constant 0 : i32
    return %c0_i32, %c0_i32_0 : i32, i32
  }
  func.func @transform_8(%arg0: i32) -> (i32, i32) {
    %c0_i32 = arith.constant 0 : i32
    %c0_i32_0 = arith.constant 0 : i32
    %c0_i32_1 = arith.constant 0 : i32
    return %c0_i32, %c0_i32_0 : i32, i32
  }
  func.func @transform_9(%arg0: i32) -> (i32, i32) {
    %c0_i32 = arith.constant 0 : i32
    %c0_i32_0 = arith.constant 0 : i32
    return %arg0, %c0_i32 : i32, i32
  }
}

</mosaic_0001>

<bundles_post_ra>
// kernel: tpu_custom_call.1
= control target key start
LH: loop header
LB: loop body
LE: loop exit
PB: predicated region body
PF: predicated region fallthrough
CT: control target
= control target key end

     0   :  { %14 = vsyncpa [#allocation3], 0  ;;  %s1831_s0 = inlined_call_operand.hbm [shape: f32[16,32], index: 0, kind: input, shape index: {}]   ;;  %s1832_s1 = inlined_call_operand.hbm [shape: bf16[32,512], index: 1, kind: input, shape index: {}]   ;;  %s1833_s2 = inlined_call_operand.hbm [shape: f32[1,512], index: 2, kind: input, shape index: {}]   ;;  %s1834_s3 = inlined_call_operand.hbm [shape: bf16[512,256], index: 3, kind: input, shape index: {}]   ;;  %s1835_s4 = inlined_call_operand.vmem [shape: f32[1,256], index: 4, kind: input, shape index: {}]   ;;  %s1836_s5 = inlined_call_operand.hbm [shape: bf16[256,128], index: 5, kind: input, shape index: {}]   ;;  %s1837_s6 = inlined_call_operand.vmem [shape: f32[1,128], index: 6, kind: input, shape index: {}]   ;;  %s1838_s7 = inlined_call_operand.hbm [shape: bf16[128,128], index: 7, kind: input, shape index: {}]   ;;  %s1839_s8 = inlined_call_operand.vmem [shape: f32[1,128], index: 8, kind: input, shape index: {}]   ;;  %s1840_s9 = inlined_call_operand.hbm [shape: f32[16,128], index: 9, kind: output, shape index: {}]  }
   0x1   :  { %15 = vsyncpa [#allocation6], 0 }
   0x2   :  { %16 = vsyncpa [#allocation9], 0 }
   0x3   :  { %17 = vsyncpa [#allocation12], 0  ;;  %s36_s11 = sshll.u32 %s1832_s1, 4  ;;  %s37_s11 = int_to_ptr.hbm [resolvable:$true] %s36_s11 }
   0x4   :  { %18 = vsyncpa [#allocation4], 0  ;;  %s1713_s12 = smov [#allocation5]   ;;  %s1714_s14 = smov 256  }
   0x5   :  { %s38_s13 = sshll.u32 %s1713_s12, 4  ;;  %s1715_s15 = smov 16   ;;  %s39_s13 = int_to_ptr.vmem [resolvable:$true] %s38_s13 }
   0x6   :  { %44 = dma.hbm_to_vmem [thread:$0]  %s37_s11, 1024, %s39_s13, [#allocation6], %s1714_s14, %s1714_s14, %s1715_s15  }
   0x7   :  { %s60_s18 = sshll.u32 %s1834_s3, 4  ;;  %s1716_s19 = smov [#allocation8]   ;;  %s61_s18 = int_to_ptr.hbm [resolvable:$true] %s60_s18 }
   0x8   :  { %s62_s20 = sshll.u32 %s1716_s19, 4  ;;  %s23_s23 = sshll.u32 %s1831_s0, 4  ;;  %s63_s20 = int_to_ptr.vmem [resolvable:$true] %s62_s20  ;;  %s24_s23 = int_to_ptr.hbm [resolvable:$true] %s23_s23 }
   0x9   :  { %s1717_s1 = smov 128   ;;  %s1718_s24 = smov 8  }
   0xa   :  { %68 = dma.hbm_to_vmem [thread:$0]  %s61_s18, 8192, %s63_s20, [#allocation9], %s1717_s1, %s1717_s1, %s1718_s24  }
   0xb   :  { %s50_s27 = sshll.u32 %s1833_s2, 4  ;;  %s1719_s3 = smov [#allocation2]   ;;  %s51_s27 = int_to_ptr.hbm [resolvable:$true] %s50_s27 }
   0xc   :  { %s25_s28 = sshll.u32 %s1719_s3, 4  ;;  %s1720_s0 = smov [#allocation7]   ;;  %s26_s28 = int_to_ptr.vmem [resolvable:$true] %s25_s28 }
   0xd   :  { %31 = dma.hbm_to_vmem [thread:$0]  %s24_s23, 256, %s26_s28, [#allocation3], %s1717_s1, %s1717_s1, %s1718_s24  }
   0xe   :  { %s52_s29 = sshll.u32 %s1720_s0, 4  ;;  %s75_s11 = sshll.u32 %s1836_s5, 4  ;;  %s53_s29 = int_to_ptr.vmem [resolvable:$true] %s52_s29  ;;  %s76_s11 = int_to_ptr.hbm [resolvable:$true] %s75_s11 }
   0xf   :  { %55 = dma.hbm_to_vmem [thread:$0]  %s51_s27, 64, %s53_s29, [#allocation6]  }
  0x10   :  { %s1721_s12 = smov [#allocation10]   ;;  %s90_s15 = sshll.u32 %s1838_s7, 4  ;;  %s91_s15 = int_to_ptr.hbm [resolvable:$true] %s90_s15 }
  0x11   :  { %s77_s13 = sshll.u32 %s1721_s12, 4  ;;  %s1722_s16 = smov 64   ;;  %s78_s13 = int_to_ptr.vmem [resolvable:$true] %s77_s13 }
  0x12   :  { %s1723_s17 = smov 4   ;;  %s1724_s18 = smov [#allocation11]  }
  0x13   :  { %83 = dma.hbm_to_vmem [thread:$0]  %s76_s11, 2048, %s78_s13, [#allocation9], %s1722_s16, %s1722_s16, %s1723_s17  }
  0x14   :  { %s92_s19 = sshll.u32 %s1724_s18, 4  ;;  %s93_s19 = int_to_ptr.vmem [resolvable:$true] %s92_s19 }
  0x15   :  { %98 = dma.hbm_to_vmem [thread:$0]  %s91_s15, 1024, %s93_s19, [#allocation12], %s1722_s16, %s1722_s16, %s1723_s17  }
  0x16   :  { %1703 = dma.done.wait [#allocation3], 256  }
  0x17   :  { %1704 = vsyncadd [#allocation3], 4294967040 }
  0x18   :  { %1705 = dma.done.wait [#allocation6], 1088  }
  0x19   :  { %1706 = vsyncadd [#allocation6], 4294966208 }
  0x1a   :  { %1707 = dma.done.wait [#allocation9], 10240  }
  0x1b   :  { %1708 = vsyncadd [#allocation9], 4294957056 }
  0x1c   :  { %1709 = dma.done.wait [#allocation12], 1024  }
  0x1d   :  { %1710 = vsyncadd [#allocation12], 4294966272  ;;  %v1054_v0 = vld [vmem:[#allocation5 + $0x20] sm:$0xf]  ;;  %v1430_v1 = vld [vmem:[#allocation5 + $0x2c] sm:$0xf0] }
  0x1e   :  { %v1428_v2 = vld [vmem:[#allocation5 + $0x24] sm:$0xf]  ;;  %v1055_v3 = vor.u32 %v1430_v1, %v1054_v0  ;;  %v1056_v4 = vld [vmem:[#allocation5 + $0x30] sm:$0xf0]  ;;  %v1062_v5 = vld [vmem:[#allocation5 + $0x28] sm:$0xf] }
  0x1f   :  { %v1431_v6 = vld [vmem:[#allocation5 + $0x34] sm:$0xf0]  ;;  %v1059_v7 = vor.u32 %v1428_v2, %v1056_v4  ;;  %v1038_v9 = vld [vmem:[#allocation5] sm:$0xf]  ;;  %v1426_v10 = vld [vmem:[#allocation5 + $0xc] sm:$0xf0] }
  0x20   :  { %v1063_v8 = vor.u32 %v1431_v6, %v1062_v5  ;;  %v1424_v11 = vld [vmem:[#allocation5 + $0x4] sm:$0xf]  ;;  %197 = vmatpush.bf16.msra.mxu3 %v1055_v3  ;;  %v1039_v12 = vor.u32 %v1426_v10, %v1038_v9  ;;  %v1040_v13 = vld [vmem:[#allocation5 + $0x10] sm:$0xf0]  ;;  %v1046_v14 = vld [vmem:[#allocation5 + $0x8] sm:$0xf] }
  0x21   :  { %v1427_v15 = vld [vmem:[#allocation5 + $0x14] sm:$0xf0]  ;;  %211 = vmatpush.bf16.msra.mxu1 %v1059_v7  ;;  %v1043_v16 = vor.u32 %v1424_v11, %v1040_v13  ;;  %v126_v18 = vld [vmem:[#allocation2] sm:$0xff]  ;;  %vm187_vm0 = vcmask 261120   ;;  %v1429_v20 = vld [vmem:[#allocation5 + $0x2c] sm:$0xf] }
  0x22   :  { %225 = vmatpush.bf16.msra.mxu2 %v1063_v8  ;;  %v1047_v17 = vor.u32 %v1427_v15, %v1046_v14  ;;  %v127_v19 = vld [vmem:[#allocation2 + $0x8] sm:$0xff]  ;;  %v1425_v22 = vld [vmem:[#allocation5 + $0xc] sm:$0xf]  ;;  %v1194_v26 = vld [vmem:[#allocation8 + $0xf0] sm:$0xf]  ;;  %s1725_s23 = smov [#allocation13]  }
  0x23   :  { %v1064_v21 = vld [vmem:[#allocation5 + $0x38] sm:$0xf0]  ;;  %v1800_v24 = vpack.c.bf16 %v127_v19, %v126_v18  ;;  %v1186_v28 = vld [vmem:[#allocation8 + $0xe0] sm:$0xf]  ;;  %v1461_v30 = vld [vmem:[#allocation8 + $0xe4] sm:$0xf0] }
  0x24   :  { %v1048_v23 = vld [vmem:[#allocation5 + $0x18] sm:$0xf0]  ;;  %v1067_v25 = vor.u32 %v1429_v20, %v1064_v21  ;;  %198 = vmatpush.bf16.msra.mxu3 %v1039_v12  ;;  %v1130_v31 = vld [vmem:[#allocation8 + $0x70] sm:$0xf]  ;;  %v1187_v37 = vor.u32 %v1461_v30, %v1186_v28  ;;  %v1122_v40 = vld [vmem:[#allocation8 + $0x60] sm:$0xf] }
  0x25   :  { %v1463_v27 = vld [vmem:[#allocation8 + $0xf4] sm:$0xf0]  ;;  %212 = vmatpush.bf16.msra.mxu1 %v1043_v16  ;;  %v1258_v34 = vld [vmem:[#allocation8 + $0x170] sm:$0xf]  ;;  %v1051_v36 = vor.u32 %v1425_v22, %v1048_v23  ;;  %v1445_v41 = vld [vmem:[#allocation8 + $0x64] sm:$0xf0] }
  0x26   :  { %v1195_v29 = vor.u32 %v1463_v27, %v1194_v26  ;;  %v1447_v32 = vld [vmem:[#allocation8 + $0x74] sm:$0xf0]  ;;  %226 = vmatpush.bf16.msra.mxu2 %v1047_v17  ;;  %v1178_v39 = vld [vmem:[#allocation8 + $0xd0] sm:$0xf]  ;;  %v1123_v43 = vor.u32 %v1445_v41, %v1122_v40  ;;  %v1250_v44 = vld [vmem:[#allocation8 + $0x160] sm:$0xf] }
  0x27   :  { %v1131_v33 = vor.u32 %v1447_v32, %v1130_v31  ;;  %v1479_v35 = vld [vmem:[#allocation8 + $0x174] sm:$0xf0]  ;;  %1068 = vmatmul.msk.bf16.vlgmr.msra.gmra.mxu3 %vm187_vm0, %v1800_v24  ;;  %v1477_v45 = vld [vmem:[#allocation8 + $0x164] sm:$0xf0]  ;;  %v1114_v46 = vld [vmem:[#allocation8 + $0x50] sm:$0xf] }
  0x28   :  { %239 = vmatpush.bf16.msrb.mxu3 %v1067_v25  ;;  %v1259_v38 = vor.u32 %v1479_v35, %v1258_v34  ;;  %v1459_v42 = vld [vmem:[#allocation8 + $0xd4] sm:$0xf0]  ;;  %1069 = vmatmul.msk.bf16.vlgmr.msra.gmra.mxu1 %vm187_vm0, %v1800_v24  ;;  %v1251_v48 = vor.u32 %v1477_v45, %v1250_v44  ;;  %v1242_v50 = vld [vmem:[#allocation8 + $0x150] sm:$0xf]  ;;  %v1170_v52 = vld [vmem:[#allocation8 + $0xc0] sm:$0xf] }
  0x29   :  { %663 = vmatpush.bf16.msrb.mxu1 %v1195_v29  ;;  %649 = vmatpush.bf16.msra.mxu0 %v1131_v33  ;;  %v1443_v47 = vld [vmem:[#allocation8 + $0x54] sm:$0xf0]  ;;  %v1179_v49 = vor.u32 %v1459_v42, %v1178_v39  ;;  %v1457_v53 = vld [vmem:[#allocation8 + $0xc4] sm:$0xf0]  ;;  %v1106_v55 = vld [vmem:[#allocation8 + $0x40] sm:$0xf] }
  0x2a   :  { %1070 = vmatmul.msk.bf16.vlgmr.msra.gmra.mxu2 %vm187_vm0, %v1800_v24  ;;  %v1475_v51 = vld [vmem:[#allocation8 + $0x154] sm:$0xf0]  ;;  %v1115_v54 = vor.u32 %v1443_v47, %v1114_v46  ;;  %v1441_v56 = vld [vmem:[#allocation8 + $0x44] sm:$0xf0]  ;;  %v1322_v58 = vld [vmem:[#allocation8 + $0x1f0] sm:$0xf]  ;;  %v1171_v59 = vor.u32 %v1457_v53, %v1170_v52 }
  0x2b   :  { %677 = vmatpush.bf16.msrb.mxu2 %v1259_v38  ;;  %v1243_v57 = vor.u32 %v1475_v51, %v1242_v50  ;;  %v1234_v60 = vld [vmem:[#allocation8 + $0x140] sm:$0xf]  ;;  %v1473_v61 = vld [vmem:[#allocation8 + $0x144] sm:$0xf0]  ;;  %v1495_v62 = vld [vmem:[#allocation8 + $0x1f4] sm:$0xf0]  ;;  %v1107_v1 = vor.u32 %v1441_v56, %v1106_v55 }
  0x2c   :  { %240 = vmatpush.bf16.msrb.mxu3 %v1051_v36  ;;  %v1162_v63 = vld [vmem:[#allocation8 + $0xb0] sm:$0xf]  ;;  %v1455_v0 = vld [vmem:[#allocation8 + $0xb4] sm:$0xf0]  ;;  %v1323_v3 = vor.u32 %v1495_v62, %v1322_v58  ;;  %v1314_v5 = vld [vmem:[#allocation8 + $0x1e0] sm:$0xf]  ;;  %v1235_v7 = vor.u32 %v1473_v61, %v1234_v60 }
  0x2d   :  { %664 = vmatpush.bf16.msrb.mxu1 %v1187_v37  ;;  %650 = vmatpush.bf16.msra.mxu0 %v1123_v43  ;;  %v1098_v2 = vld [vmem:[#allocation8 + $0x30] sm:$0xf]  ;;  %v1439_v4 = vld [vmem:[#allocation8 + $0x34] sm:$0xf0]  ;;  %v1493_v6 = vld [vmem:[#allocation8 + $0x1e4] sm:$0xf0]  ;;  %v1163_v10 = vor.u32 %v1455_v0, %v1162_v63 }
  0x2e   :  { %v1226_v8 = vld [vmem:[#allocation8 + $0x130] sm:$0xf]  ;;  %v1315_v9 = vor.u32 %v1493_v6, %v1314_v5  ;;  %v1471_v11 = vld [vmem:[#allocation8 + $0x134] sm:$0xf0]  ;;  %v1154_v12 = vld [vmem:[#allocation8 + $0xa0] sm:$0xf]  ;;  %v1099_v14 = vor.u32 %v1439_v4, %v1098_v2 }
  0x2f   :  { %678 = vmatpush.bf16.msrb.mxu2 %v1251_v48  ;;  %v1453_v13 = vld [vmem:[#allocation8 + $0xa4] sm:$0xf0]  ;;  %v1090_v15 = vld [vmem:[#allocation8 + $0x20] sm:$0xf]  ;;  %v1227_v17 = vor.u32 %v1471_v11, %v1226_v8  ;;  %v1146_v21 = vld [vmem:[#allocation8 + $0x90] sm:$0xf] }
  0x30   :  { %691 = vmatpush.bf16.msra.mxu3 %v1323_v3  ;;  %v1437_v16 = vld [vmem:[#allocation8 + $0x24] sm:$0xf0]  ;;  %v1155_v18 = vor.u32 %v1453_v13, %v1154_v12  ;;  %v1218_v19 = vld [vmem:[#allocation8 + $0x120] sm:$0xf]  ;;  %v1451_v22 = vld [vmem:[#allocation8 + $0x94] sm:$0xf0] }
  0x31   :  { %665 = vmatpush.bf16.msrb.mxu1 %v1179_v49  ;;  %651 = vmatpush.bf16.msra.mxu0 %v1115_v54  ;;  %v1469_v20 = vld [vmem:[#allocation8 + $0x124] sm:$0xf0]  ;;  %v1091_v23 = vor.u32 %v1437_v16, %v1090_v15  ;;  %v1147_v26 = vor.u32 %v1451_v22, %v1146_v21  ;;  %v1138_v27 = vld [vmem:[#allocation8 + $0x80] sm:$0xf]  ;;  %v1462_v30 = vld [vmem:[#allocation8 + $0xf4] sm:$0xf] }
  0x32   :  { %v1219_v25 = vor.u32 %v1469_v20, %v1218_v19  ;;  %v1449_v28 = vld [vmem:[#allocation8 + $0x84] sm:$0xf0]  ;;  %v1196_v31 = vld [vmem:[#allocation8 + $0xf8] sm:$0xf0]  ;;  %v1082_v33 = vld [vmem:[#allocation8 + $0x10] sm:$0xf] }
  0x33   :  { %679 = vmatpush.bf16.msrb.mxu2 %v1243_v57  ;;  %v1139_v29 = vor.u32 %v1449_v28, %v1138_v27  ;;  %v1199_v32 = vor.u32 %v1462_v30, %v1196_v31  ;;  %v1210_v34 = vld [vmem:[#allocation8 + $0x110] sm:$0xf]  ;;  %v1467_v36 = vld [vmem:[#allocation8 + $0x114] sm:$0xf0]  ;;  %v1460_v41 = vld [vmem:[#allocation8 + $0xe4] sm:$0xf] }
  0x34   :  { %692 = vmatpush.bf16.msra.mxu3 %v1315_v9  ;;  %v1306_v37 = vld [vmem:[#allocation8 + $0x1d0] sm:$0xf]  ;;  %v1491_v38 = vld [vmem:[#allocation8 + $0x1d4] sm:$0xf0]  ;;  %v1211_v39 = vor.u32 %v1467_v36, %v1210_v34  ;;  %v1188_v42 = vld [vmem:[#allocation8 + $0xe8] sm:$0xf0] }
  0x35   :  { %666 = vmatpush.bf16.msrb.mxu1 %v1171_v59  ;;  %652 = vmatpush.bf16.msra.mxu0 %v1107_v1  ;;  %v1307_v40 = vor.u32 %v1491_v38, %v1306_v37  ;;  %v1191_v43 = vor.u32 %v1460_v41, %v1188_v42  ;;  %v1074_v44 = vld [vmem:[#allocation8] sm:$0xf]  ;;  %v1433_v45 = vld [vmem:[#allocation8 + $0x4] sm:$0xf0]  ;;  %v1446_v53 = vld [vmem:[#allocation8 + $0x74] sm:$0xf] }
  0x36   :  { %v1202_v46 = vld [vmem:[#allocation8 + $0x100] sm:$0xf]  ;;  %v1075_v47 = vor.u32 %v1433_v45, %v1074_v44  ;;  %v1465_v48 = vld [vmem:[#allocation8 + $0x104] sm:$0xf0]  ;;  %v1132_v54 = vld [vmem:[#allocation8 + $0x78] sm:$0xf0] }
  0x37   :  { %680 = vmatpush.bf16.msrb.mxu2 %v1235_v7  ;;  %1071 = vmatmul.msk.bf16.vlgmr.msrb.gmra.mxu3 %vm187_vm0, %v1800_v24  ;;  %v1435_v24 = vld [vmem:[#allocation8 + $0x14] sm:$0xf0]  ;;  %v1298_v49 = vld [vmem:[#allocation8 + $0x1c0] sm:$0xf]  ;;  %v1489_v50 = vld [vmem:[#allocation8 + $0x1c4] sm:$0xf0]  ;;  %v1203_v51 = vor.u32 %v1465_v48, %v1202_v46  ;;  %v1135_v55 = vor.u32 %v1446_v53, %v1132_v54 }
  0x38   :  { %v1083_v35 = vor.u32 %v1435_v24, %v1082_v33  ;;  %693 = vmatpush.bf16.msra.mxu3 %v1307_v40  ;;  %v1299_v52 = vor.u32 %v1489_v50, %v1298_v49  ;;  %v1478_v56 = vld [vmem:[#allocation8 + $0x174] sm:$0xf]  ;;  %v1260_v57 = vld [vmem:[#allocation8 + $0x178] sm:$0xf0]  ;;  %v1290_v61 = vld [vmem:[#allocation8 + $0x1b0] sm:$0xf] }
  0x39   :  { %667 = vmatpush.bf16.msrb.mxu1 %v1163_v10  ;;  %653 = vmatpush.bf16.msra.mxu0 %v1099_v14  ;;  %v1458_v58 = vld [vmem:[#allocation8 + $0xd4] sm:$0xf]  ;;  %v1263_v59 = vor.u32 %v1478_v56, %v1260_v57  ;;  %v1180_v60 = vld [vmem:[#allocation8 + $0xd8] sm:$0xf0]  ;;  %v1487_v62 = vld [vmem:[#allocation8 + $0x1b4] sm:$0xf0] }
  0x3a   :  { %v1183_v63 = vor.u32 %v1458_v58, %v1180_v60  ;;  %v1291_v0 = vor.u32 %v1487_v62, %v1290_v61  ;;  %v1444_v1 = vld [vmem:[#allocation8 + $0x64] sm:$0xf]  ;;  %v1124_v2 = vld [vmem:[#allocation8 + $0x68] sm:$0xf0]  ;;  %v1282_v10 = vld [vmem:[#allocation8 + $0x1a0] sm:$0xf] }
  0x3b   :  { %681 = vmatpush.bf16.msrb.mxu2 %v1227_v17  ;;  %v1476_v3 = vld [vmem:[#allocation8 + $0x164] sm:$0xf]  ;;  %v1127_v4 = vor.u32 %v1444_v1, %v1124_v2  ;;  %v1252_v5 = vld [vmem:[#allocation8 + $0x168] sm:$0xf0]  ;;  %v1485_v11 = vld [vmem:[#allocation8 + $0x1a4] sm:$0xf0] }
  0x3c   :  { %694 = vmatpush.bf16.msra.mxu3 %v1299_v52  ;;  %v1255_v6 = vor.u32 %v1476_v3, %v1252_v5  ;;  %v1456_v7 = vld [vmem:[#allocation8 + $0xc4] sm:$0xf]  ;;  %v1172_v8 = vld [vmem:[#allocation8 + $0xc8] sm:$0xf0]  ;;  %v1283_v12 = vor.u32 %v1485_v11, %v1282_v10  ;;  %v1442_v13 = vld [vmem:[#allocation8 + $0x54] sm:$0xf] }
  0x3d   :  { %668 = vmatpush.bf16.msrb.mxu1 %v1155_v18  ;;  %654 = vmatpush.bf16.msra.mxu0 %v1091_v23  ;;  %v1175_v9 = vor.u32 %v1456_v7, %v1172_v8  ;;  %v1116_v14 = vld [vmem:[#allocation8 + $0x58] sm:$0xf0]  ;;  %v1474_v15 = vld [vmem:[#allocation8 + $0x154] sm:$0xf]  ;;  %v1274_v22 = vld [vmem:[#allocation8 + $0x190] sm:$0xf] }
  0x3e   :  { %v1119_v16 = vor.u32 %v1442_v13, %v1116_v14  ;;  %v1244_v17 = vld [vmem:[#allocation8 + $0x158] sm:$0xf0]  ;;  %v1454_v19 = vld [vmem:[#allocation8 + $0xb4] sm:$0xf]  ;;  %v1483_v23 = vld [vmem:[#allocation8 + $0x194] sm:$0xf0] }
  0x3f   :  { %682 = vmatpush.bf16.msrb.mxu2 %v1219_v25  ;;  %v1247_v18 = vor.u32 %v1474_v15, %v1244_v17  ;;  %v1164_v20 = vld [vmem:[#allocation8 + $0xb8] sm:$0xf0]  ;;  %v1275_v25 = vor.u32 %v1483_v23, %v1274_v22  ;;  %v1108_v27 = vld [vmem:[#allocation8 + $0x48] sm:$0xf0]  ;;  %v1472_v28 = vld [vmem:[#allocation8 + $0x144] sm:$0xf] }
  0x40   :  { %695 = vmatpush.bf16.msra.mxu3 %v1291_v0  ;;  %v1167_v21 = vor.u32 %v1454_v19, %v1164_v20  ;;  %v1236_v30 = vld [vmem:[#allocation8 + $0x148] sm:$0xf0]  ;;  %v1266_v34 = vld [vmem:[#allocation8 + $0x180] sm:$0xf]  ;;  %v1438_v37 = vld [vmem:[#allocation8 + $0x34] sm:$0xf] }
  0x41   :  { %669 = vmatpush.bf16.msrb.mxu1 %v1147_v26  ;;  %655 = vmatpush.bf16.msra.mxu0 %v1083_v35  ;;  %v1440_v26 = vld [vmem:[#allocation8 + $0x44] sm:$0xf]  ;;  %v1239_v31 = vor.u32 %v1472_v28, %v1236_v30  ;;  %v1156_v33 = vld [vmem:[#allocation8 + $0xa8] sm:$0xf0]  ;;  %v1481_v35 = vld [vmem:[#allocation8 + $0x184] sm:$0xf0] }
  0x42   :  { %v1267_v36 = vor.u32 %v1481_v35, %v1266_v34  ;;  %v1100_v38 = vld [vmem:[#allocation8 + $0x38] sm:$0xf0]  ;;  %v1494_v42 = vld [vmem:[#allocation8 + $0x1f4] sm:$0xf]  ;;  %v1436_v49 = vld [vmem:[#allocation8 + $0x24] sm:$0xf] }
  0x43   :  { %683 = vmatpush.bf16.msrb.mxu2 %v1211_v39  ;;  %v1470_v39 = vld [vmem:[#allocation8 + $0x134] sm:$0xf]  ;;  %v1103_v40 = vor.u32 %v1438_v37, %v1100_v38  ;;  %v1228_v41 = vld [vmem:[#allocation8 + $0x138] sm:$0xf0]  ;;  %v1092_v50 = vld [vmem:[#allocation8 + $0x28] sm:$0xf0] }
  0x44   :  { %696 = vmatpush.bf16.msra.mxu3 %v1283_v12  ;;  %v1231_v44 = vor.u32 %v1470_v39, %v1228_v41  ;;  %v1450_v46 = vld [vmem:[#allocation8 + $0x94] sm:$0xf]  ;;  %v1095_v52 = vor.u32 %v1436_v49, %v1092_v50  ;;  %v1220_v53 = vld [vmem:[#allocation8 + $0x128] sm:$0xf0]  ;;  %v1492_v54 = vld [vmem:[#allocation8 + $0x1e4] sm:$0xf] }
  0x45   :  { %670 = vmatpush.bf16.msrb.mxu1 %v1139_v29  ;;  %656 = vmatpush.bf16.msra.mxu0 %v1075_v47  ;;  %v1111_v29 = vor.u32 %v1440_v26, %v1108_v27  ;;  %v1148_v47 = vld [vmem:[#allocation8 + $0x98] sm:$0xf0]  ;;  %v1448_v58 = vld [vmem:[#allocation8 + $0x84] sm:$0xf]  ;;  %v1434_v61 = vld [vmem:[#allocation8 + $0x14] sm:$0xf] }
  0x46   :  { %v1151_v48 = vor.u32 %v1450_v46, %v1148_v47  ;;  %v1084_v62 = vld [vmem:[#allocation8 + $0x18] sm:$0xf0]  ;;  %v1490_v2 = vld [vmem:[#allocation8 + $0x1d4] sm:$0xf]  ;;  %v1432_v7 = vld [vmem:[#allocation8 + $0x4] sm:$0xf] }
  0x47   :  { %684 = vmatpush.bf16.msrb.mxu2 %v1203_v51  ;;  %v1468_v51 = vld [vmem:[#allocation8 + $0x124] sm:$0xf]  ;;  %v1087_v0 = vor.u32 %v1434_v61, %v1084_v62  ;;  %v1212_v1 = vld [vmem:[#allocation8 + $0x118] sm:$0xf0]  ;;  %v1076_v8 = vld [vmem:[#allocation8 + $0x8] sm:$0xf0] }
  0x48   :  { %697 = vmatpush.bf16.msra.mxu3 %v1275_v25  ;;  %v1223_v56 = vor.u32 %v1468_v51, %v1220_v53  ;;  %v1308_v3 = vld [vmem:[#allocation8 + $0x1d8] sm:$0xf0]  ;;  %v1079_v11 = vor.u32 %v1432_v7, %v1076_v8  ;;  %v1204_v12 = vld [vmem:[#allocation8 + $0x108] sm:$0xf0]  ;;  %v1488_v13 = vld [vmem:[#allocation8 + $0x1c4] sm:$0xf] }
  0x49   :  { %719 = vmatpush.bf16.msra.mxu1 %v1199_v32  ;;  %705 = vmatpush.bf16.msrb.mxu0 %v1135_v55  ;;  %v1452_v32 = vld [vmem:[#allocation8 + $0xa4] sm:$0xf]  ;;  %v1316_v55 = vld [vmem:[#allocation8 + $0x1e8] sm:$0xf0]  ;;  %v1311_v5 = vor.u32 %v1490_v2, %v1308_v3  ;;  %v1292_v19 = vld [vmem:[#allocation8 + $0x1b8] sm:$0xf0] }
  0x4a   :  { %v1159_v24 = vor.u32 %v1452_v32, %v1156_v33  ;;  %v1319_v57 = vor.u32 %v1492_v54, %v1316_v55  ;;  %v1300_v14 = vld [vmem:[#allocation8 + $0x1c8] sm:$0xf0]  ;;  %v1484_v23 = vld [vmem:[#allocation8 + $0x1a4] sm:$0xf]  ;;  %v1276_v32 = vld [vmem:[#allocation8 + $0x198] sm:$0xf0] }
  0x4b   :  { %733 = vmatpush.bf16.msra.mxu2 %v1263_v59  ;;  %v1140_v59 = vld [vmem:[#allocation8 + $0x88] sm:$0xf0]  ;;  %v1303_v17 = vor.u32 %v1488_v13, %v1300_v14  ;;  %v1480_v38 = vld [vmem:[#allocation8 + $0x184] sm:$0xf]  ;;  %v1502_v61 = vld [vmem:[#allocation10 + $0x30] sm:$0xff]  ;;  %s1018_s25 = sshll.u32 %s1725_s23, 4  ;;  %s1019_s25 = int_to_ptr.vmem [resolvable:$true] %s1018_s25 }
  0x4c   :  { %698 = vmatpush.bf16.msra.mxu3 %v1267_v36  ;;  %v1143_v60 = vor.u32 %v1448_v58, %v1140_v59  ;;  %v1284_v25 = vld [vmem:[#allocation8 + $0x1a8] sm:$0xf0]  ;;  %v1498_v2 = vld [vmem:[#allocation10 + $0x10] sm:$0xff]  ;;  %v1508_v7 = vld [vmem:[#allocation10 + $0x60] sm:$0xff]  ;;  %s1020_s27 = sshll.u32 %s1840_s9, 4  ;;  %s1021_s27 = int_to_ptr.hbm [resolvable:$true] %s1020_s27 }
  0x4d   :  { %720 = vmatpush.bf16.msra.mxu1 %v1191_v43  ;;  %706 = vmatpush.bf16.msrb.mxu0 %v1127_v4  ;;  %v1324_v43 = vld [vmem:[#allocation8 + $0x1f8] sm:$0xf0]  ;;  %v1287_v28 = vor.u32 %v1484_v23, %v1284_v25  ;;  %v1268_v39 = vld [vmem:[#allocation8 + $0x188] sm:$0xf0]  ;;  %v1510_v3 = vld [vmem:[#allocation10 + $0x70] sm:$0xff] }
  0x4e   :  { %v1327_v45 = vor.u32 %v1494_v42, %v1324_v43  ;;  %v1271_v46 = vor.u32 %v1480_v38, %v1268_v39  ;;  %v1501_v62 = vld [vmem:[#allocation10 + $0x28] sm:$0xff]  ;;  %v1507_v8 = vld [vmem:[#allocation10 + $0x58] sm:$0xff] }
  0x4f   :  { %734 = vmatpush.bf16.msra.mxu2 %v1255_v6  ;;  %v1810_v6 = vld [vmem:[#allocation7] sm:$0xf]  ;;  %v1505_v13 = vld [vmem:[#allocation10 + $0x48] sm:$0xff] }
  0x50   :  { %747 = vmatpush.bf16.msrb.mxu3 %v1327_v45  ;;  %v140_v15 = vperm.slane %v1810_v6, 1  ;;  %v141_v27 = vperm.slane %v1810_v6, 2  ;;  %v142_v53 = vperm.slane %v1810_v6, 3  ;;  %v323_v14 = vld [vmem:[%s1835_s4] sm:$0x3] }
  0x51   :  { %721 = vmatpush.bf16.msra.mxu1 %v1183_v63  ;;  %707 = vmatpush.bf16.msrb.mxu0 %v1119_v16  ;;  %v1466_v63 = vld [vmem:[#allocation8 + $0x114] sm:$0xf] }
  0x52   :  { %v1215_v4 = vor.u32 %v1466_v63, %v1212_v1  ;;  %v1500_v63 = vld [vmem:[#allocation10 + $0x20] sm:$0xff]  ;;  %v1511_v1 = vld [vmem:[#allocation10 + $0x78] sm:$0xff] }
  0x53   :  { %735 = vmatpush.bf16.msra.mxu2 %v1247_v18  ;;  %v1486_v18 = vld [vmem:[#allocation8 + $0x1b4] sm:$0xf] }
  0x54   :  { %748 = vmatpush.bf16.msrb.mxu3 %v1319_v57  ;;  %v1295_v20 = vor.u32 %v1486_v18, %v1292_v19 }
  0x55   :  { %722 = vmatpush.bf16.msra.mxu1 %v1175_v9  ;;  %708 = vmatpush.bf16.msrb.mxu0 %v1111_v29  ;;  %v1464_v9 = vld [vmem:[#allocation8 + $0x104] sm:$0xf]  ;;  %v139_v29 = vperm.slane %v1810_v6, 0 }
  0x56   :  { %v1207_v16 = vor.u32 %v1464_v9, %v1204_v12  ;;  %v1496_v6 = vld [vmem:[#allocation10] sm:$0xff] }
  0x57   :  { %736 = vmatpush.bf16.msra.mxu2 %v1239_v31  ;;  %v1482_v31 = vld [vmem:[#allocation8 + $0x194] sm:$0xf] }
  0x58   :  { %749 = vmatpush.bf16.msrb.mxu3 %v1311_v5  ;;  %v1279_v36 = vor.u32 %v1482_v31, %v1276_v32  ;;  %v1509_v5 = vld [vmem:[#allocation10 + $0x68] sm:$0xff] }
  0x59   :  { %723 = vmatpush.bf16.msra.mxu1 %v1167_v21  ;;  %709 = vmatpush.bf16.msrb.mxu0 %v1103_v40 }
  0x5b   :  { %737 = vmatpush.bf16.msra.mxu2 %v1231_v44 }
  0x5c   :  { %750 = vmatpush.bf16.msrb.mxu3 %v1303_v17  ;;  %v1504_v17 = vld [vmem:[#allocation10 + $0x40] sm:$0xff] }
  0x5d   :  { %724 = vmatpush.bf16.msra.mxu1 %v1159_v24  ;;  %710 = vmatpush.bf16.msrb.mxu0 %v1095_v52 }
  0x5f   :  { %738 = vmatpush.bf16.msra.mxu2 %v1223_v56 }
  0x60   :  { %751 = vmatpush.bf16.msrb.mxu3 %v1295_v20 }
  0x61   :  { %725 = vmatpush.bf16.msra.mxu1 %v1151_v48  ;;  %711 = vmatpush.bf16.msrb.mxu0 %v1087_v0  ;;  %v1499_v0 = vld [vmem:[#allocation10 + $0x18] sm:$0xff] }
  0x63   :  { %739 = vmatpush.bf16.msra.mxu2 %v1215_v4  ;;  %v1497_v4 = vld [vmem:[#allocation10 + $0x8] sm:$0xff] }
  0x64   :  { %752 = vmatpush.bf16.msrb.mxu3 %v1287_v28 }
  0x65   :  { %726 = vmatpush.bf16.msra.mxu1 %v1143_v60  ;;  %712 = vmatpush.bf16.msrb.mxu0 %v1079_v11  ;;  %v1503_v60 = vld [vmem:[#allocation10 + $0x38] sm:$0xff] }
  0x67   :  { %740 = vmatpush.bf16.msra.mxu2 %v1207_v16  ;;  %v325_v16 = vperm.slane %v323_v14, 0 }
  0x68   :  { %753 = vmatpush.bf16.msrb.mxu3 %v1279_v36 }
  0x6c   :  { %754 = vmatpush.bf16.msrb.mxu3 %v1271_v46 }
  0xa5   :  { %v214_v10 = vpop.f32.mrf.mxu1 }
  0xa6   :  { %v215_v21 = vadd.f32 %v214_v10, %v140_v15  ;;  %v1506_v10 = vld [vmem:[#allocation10 + $0x50] sm:$0xff] }
  0xa8   :  { %v248_v33 = vmax.f32 %v215_v21, 0.0 }
  0xaa   :  { %v200_v22 = vpop.f32.mrf.mxu3 }
  0xab   :  { %v201_v37 = vadd.f32 %v200_v22, %v139_v29 }
  0xad   :  { %v228_v26 = vpop.f32.mrf.mxu2  ;;  %v216_v30 = vpop.f32.mrf.mxu1  ;;  %v247_v47 = vmax.f32 %v201_v37, 0.0 }
  0xae   :  { %v217_v24 = vadd.f32 %v216_v30, %v140_v15  ;;  %v229_v34 = vadd.f32 %v228_v26, %v141_v27 }
  0xb0   :  { %v252_v35 = vmax.f32 %v217_v24, 0.0  ;;  %v249_v44 = vmax.f32 %v229_v34, 0.0  ;;  %v326_v24 = vperm.slane %v323_v14, 1 }
  0xb2   :  { %v256_v40 = vpack.c.bf16 %v252_v35, %v248_v33  ;;  %v202_v41 = vpop.f32.mrf.mxu3 }
  0xb3   :  { %v203_v42 = vadd.f32 %v202_v41, %v139_v29 }
  0xb4   :  { %671 = vmatmul.bf16.vlgmr.msrb.gmra.mxu1 %v256_v40 }
  0xb5   :  { %v230_v43 = vpop.f32.mrf.mxu2  ;;  %v251_v48 = vmax.f32 %v203_v42, 0.0  ;;  %913 = vmatpush.bf16.msrb.mxu1 %v1511_v1 }
  0xb6   :  { %v231_v45 = vadd.f32 %v230_v43, %v141_v27 }
  0xb7   :  { %v255_v50 = vpack.c.bf16 %v251_v48, %v247_v47 }
  0xb8   :  { %v253_v49 = vmax.f32 %v231_v45, 0.0 }
  0xb9   :  { %657 = vmatmul.bf16.vlgmr.msra.gmra.mxu0 %v255_v50  ;;  %914 = vmatpush.bf16.msrb.mxu1 %v1510_v3 }
  0xba   :  { %v257_v51 = vpack.c.bf16 %v253_v49, %v249_v44  ;;  %v242_v52 = vpop.f32.mrf.mxu3  ;;  %899 = vmatpush.bf16.msra.mxu0 %v1503_v60  ;;  %v1512_v60 = vld [vmem:[#allocation11] sm:$0xff] }
  0xbb   :  { %v243_v54 = vadd.f32 %v242_v52, %v142_v53 }
  0xbc   :  { %685 = vmatmul.bf16.vlgmr.msrb.gmra.mxu2 %v257_v51 }
  0xbd   :  { %v250_v57 = vmax.f32 %v243_v54, 0.0  ;;  %915 = vmatpush.bf16.msrb.mxu1 %v1509_v5  ;;  %v1518_v54 = vld [vmem:[#allocation11 + $0x30] sm:$0xff] }
  0xbe   :  { %900 = vmatpush.bf16.msra.mxu0 %v1502_v61 }
  0xc1   :  { %916 = vmatpush.bf16.msrb.mxu1 %v1508_v7 }
  0xc2   :  { %v244_v55 = vpop.f32.mrf.mxu3  ;;  %901 = vmatpush.bf16.msra.mxu0 %v1501_v62 }
  0xc3   :  { %v245_v56 = vadd.f32 %v244_v55, %v142_v53  ;;  %v1519_v53 = vld [vmem:[#allocation11 + $0x38] sm:$0xff]  ;;  %v1517_v55 = vld [vmem:[#allocation11 + $0x28] sm:$0xff] }
  0xc4   :  { %727 = vmatmul.bf16.vlgmr.msra.gmra.mxu1 %v256_v40  ;;  %998 = vmatpush.bf16.msrb.mxu2 %v1519_v53 }
  0xc5   :  { %v254_v58 = vmax.f32 %v245_v56, 0.0  ;;  %917 = vmatpush.bf16.msrb.mxu1 %v1507_v8  ;;  %v1516_v56 = vld [vmem:[#allocation11 + $0x20] sm:$0xff] }
  0xc6   :  { %902 = vmatpush.bf16.msra.mxu0 %v1500_v63  ;;  %v1533_v63 = vld [vmem:[%s1837_s6] ss:$0 sm:$0xff] }
  0xc7   :  { %v258_v59 = vpack.c.bf16 %v254_v58, %v250_v57  ;;  %v1515_v57 = vld [vmem:[#allocation11 + $0x18] sm:$0xff]  ;;  %v1514_v58 = vld [vmem:[#allocation11 + $0x10] sm:$0xff] }
  0xc8   :  { %999 = vmatpush.bf16.msrb.mxu2 %v1518_v54 }
  0xc9   :  { %699 = vmatmul.bf16.vlgmr.msra.gmra.mxu3 %v258_v59  ;;  %713 = vmatmul.bf16.vlgmr.msrb.gmra.mxu0 %v255_v50 }
  0xca   :  { %903 = vmatpush.bf16.msra.mxu0 %v1499_v0  ;;  %918 = vmatpush.bf16.msrb.mxu1 %v1506_v10 }
  0xcc   :  { %741 = vmatmul.bf16.vlgmr.msra.gmra.mxu2 %v257_v51 }
  0xcd   :  { %1000 = vmatpush.bf16.msrb.mxu2 %v1517_v55 }
  0xce   :  { %904 = vmatpush.bf16.msra.mxu0 %v1498_v2  ;;  %919 = vmatpush.bf16.msrb.mxu1 %v1505_v13 }
  0xd1   :  { %1001 = vmatpush.bf16.msrb.mxu2 %v1516_v56 }
  0xd2   :  { %905 = vmatpush.bf16.msra.mxu0 %v1497_v4  ;;  %920 = vmatpush.bf16.msrb.mxu1 %v1504_v17 }
  0xd5   :  { %1002 = vmatpush.bf16.msrb.mxu2 %v1515_v57 }
  0xd6   :  { %906 = vmatpush.bf16.msra.mxu0 %v1496_v6 }
  0xd9   :  { %755 = vmatmul.bf16.vlgmr.msrb.gmra.mxu3 %v258_v59  ;;  %1003 = vmatpush.bf16.msrb.mxu2 %v1514_v58  ;;  %v1513_v59 = vld [vmem:[#allocation11 + $0x8] sm:$0xff] }
  0xdd   :  { %1004 = vmatpush.bf16.msrb.mxu2 %v1513_v59 }
  0xe1   :  { %1005 = vmatpush.bf16.msrb.mxu2 %v1512_v60 }
 0x131   :  { %v672_v11 = vpop.f32.mrf.mxu1 }
 0x136   :  { %v658_v9 = vpop.f32.mrf.mxu0 }
 0x137   :  { %v659_v18 = vadd.f32 %v658_v9, %v325_v16  ;;  %v1534_v9 = vld [vmem:[%s1839_s8] ss:$0 sm:$0xff] }
 0x139   :  { %v674_v19 = vpop.f32.mrf.mxu1  ;;  %v673_v23 = vadd.f32 %v672_v11, %v659_v18 }
 0x13e   :  { %v660_v15 = vpop.f32.mrf.mxu0 }
 0x13f   :  { %v686_v12 = vpop.f32.mrf.mxu2  ;;  %v661_v22 = vadd.f32 %v660_v15, %v325_v16 }
 0x140   :  { %v687_v26 = vadd.f32 %v686_v12, %v673_v23 }
 0x141   :  { %v675_v27 = vadd.f32 %v674_v19, %v661_v22  ;;  %v728_v32 = vpop.f32.mrf.mxu1 }
 0x146   :  { %v714_v25 = vpop.f32.mrf.mxu0 }
 0x147   :  { %v688_v20 = vpop.f32.mrf.mxu2  ;;  %v715_v38 = vadd.f32 %v714_v25, %v326_v24 }
 0x148   :  { %v689_v28 = vadd.f32 %v688_v20, %v675_v27 }
 0x149   :  { %v729_v41 = vadd.f32 %v728_v32, %v715_v38  ;;  %v730_v42 = vpop.f32.mrf.mxu1 }
 0x14c   :  { %v700_v21 = vpop.f32.mrf.mxu3 }
 0x14d   :  { %v701_v29 = vadd.f32 %v700_v21, %v687_v26 }
 0x14e   :  { %v716_v37 = vpop.f32.mrf.mxu0 }
 0x14f   :  { %v742_v33 = vpop.f32.mrf.mxu2  ;;  %v761_v34 = vmax.f32 %v701_v29, 0.0  ;;  %v717_v40 = vadd.f32 %v716_v37, %v326_v24 }
 0x150   :  { %v743_v44 = vadd.f32 %v742_v33, %v729_v41 }
 0x151   :  { %v731_v45 = vadd.f32 %v730_v42, %v717_v40 }
 0x154   :  { %v702_v30 = vpop.f32.mrf.mxu3 }
 0x155   :  { %v703_v31 = vadd.f32 %v702_v30, %v689_v28 }
 0x157   :  { %v763_v35 = vmax.f32 %v703_v31, 0.0  ;;  %v744_v43 = vpop.f32.mrf.mxu2 }
 0x158   :  { %v745_v46 = vadd.f32 %v744_v43, %v731_v45 }
 0x159   :  { %v765_v36 = vpack.c.bf16 %v763_v35, %v761_v34 }
 0x15b   :  { %907 = vmatmul.bf16.vlgmr.msra.gmra.mxu0 %v765_v36 }
 0x15c   :  { %v756_v39 = vpop.f32.mrf.mxu3 }
 0x15d   :  { %v757_v47 = vadd.f32 %v756_v39, %v743_v44 }
 0x15f   :  { %v762_v50 = vmax.f32 %v757_v47, 0.0 }
 0x164   :  { %v758_v48 = vpop.f32.mrf.mxu3 }
 0x165   :  { %v759_v49 = vadd.f32 %v758_v48, %v745_v46 }
 0x167   :  { %v764_v51 = vmax.f32 %v759_v49, 0.0 }
 0x169   :  { %v766_v52 = vpack.c.bf16 %v764_v51, %v762_v50 }
 0x16b   :  { %921 = vmatmul.bf16.vlgmr.msrb.gmra.mxu1 %v766_v52 }
 0x1d8   :  { %v908_v61 = vpop.f32.mrf.mxu0 }
 0x1d9   :  { %v909_v1 = vadd.f32 %v1533_v63, %v908_v61 }
 0x1e0   :  { %v910_v0 = vpop.f32.mrf.mxu0 }
 0x1e1   :  { %v911_v2 = vadd.f32 %v1533_v63, %v910_v0 }
 0x1e8   :  { %v922_v62 = vpop.f32.mrf.mxu1 }
 0x1e9   :  { %v923_v3 = vadd.f32 %v922_v62, %v909_v1 }
 0x1eb   :  { %v927_v6 = vmax.f32 %v923_v3, 0.0 }
 0x1f0   :  { %v924_v4 = vpop.f32.mrf.mxu1 }
 0x1f1   :  { %v925_v5 = vadd.f32 %v924_v4, %v911_v2 }
 0x1f3   :  { %v928_v7 = vmax.f32 %v925_v5, 0.0 }
 0x1f5   :  { %v929_v8 = vpack.c.bf16 %v928_v7, %v927_v6 }
 0x1f7   :  { %1006 = vmatmul.bf16.vlgmr.msrb.gmra.mxu2 %v929_v8 }
 0x27a   :  { %v1007_v10 = vpop.f32.mrf.mxu2 }
 0x27b   :  { %v1008_v11 = vadd.f32 %v1534_v9, %v1007_v10 }
 0x27d   :  { %1012 = vst [vmem:[#allocation13] sm:$0xff] %v1008_v11 }
 0x282   :  { %v1009_v12 = vpop.f32.mrf.mxu2 }
 0x283   :  { %v1010_v13 = vadd.f32 %v1534_v9, %v1009_v12 }
 0x285   :  { %1013 = vst [vmem:[#allocation13 + $0x8] sm:$0xff] %v1010_v13 }
 0x286   :  { %1026 = dma.vmem_to_hbm [thread:$0]  %s1019_s25, 256, %s1021_s27, [#allocation4], %s1717_s1, %s1717_s1, %s1718_s24  }
 0x287   :  { %1711 = dma.done.wait [#allocation4], 256  }
 0x288   :  { %1712 = vsyncadd [#allocation4], 4294967040 }
 0x289   :  { %1031 = vsyncpa [#allocation3], 1 }
 0x28a   :  { %1032 = vsyncpa [#allocation6], 1 }
 0x28b   :  { %1033 = vsyncpa [#allocation9], 1 }
 0x28c   :  { %1034 = vsyncpa [#allocation12], 1 }
 0x28d   :  { %1035 = vsyncpa [#allocation4], 1 }

</bundles_post_ra>
